<compile_context>
chip_gen: v5e
topology: v5e:2x2
jax: 0.10.0
libtpu: 0.0.40
codegen_flags: <defaults>
</compile_context>

<pallas_src>
import jax
import jax.numpy as jnp
from jax.experimental import pallas as pl
from jax.experimental.pallas import tpu as pltpu

_LANE = 128
_MiB = 1024 * 1024


def _round_up(a, b):
    return ((a + b - 1) // b) * b


def _tpu_generation():
    try:
        kind = jax.devices()[0].device_kind.lower()
    except Exception:
        return None
    for gen in (7, 6, 5):
        if f"v{gen}" in kind:
            return gen
    return None


def _hw_config():
    """Generation-specific tiling / pipelining choices (from perf review)."""
    gen = _tpu_generation()
    if gen == 7:
        # 2 TCs/chip: shard the grid across cores; bigger blocks, explicit
        # vmem limit (64 MiB physical VMEM, 32 MiB scoped default).
        return dict(gen=7, block_bytes=6 * _MiB, core_parallel=True,
                    native_lowp=True, vmem_cap=48 * _MiB)
    if gen == 6:
        # 4 MiB blocks -> 16 MiB resident, fits the 32 MiB scoped default.
        return dict(gen=6, block_bytes=4 * _MiB, core_parallel=False,
                    native_lowp=True, vmem_cap=64 * _MiB)
    if gen == 5:
        # Keep 2 MiB blocks; no bf16 VALU so low-precision math stays in f32.
        return dict(gen=5, block_bytes=2 * _MiB, core_parallel=False,
                    native_lowp=False, vmem_cap=None)
    # Unknown chip: conservative defaults (original kernel's behavior).
    return dict(gen=None, block_bytes=2 * _MiB, core_parallel=False,
                native_lowp=False, vmem_cap=None)


def _make_scale_kernel(native_lowp):
    def kernel(s_ref, x_ref, o_ref):
        # s_ref: SMEM (1,) f32 scalar; x_ref / o_ref: (tile_rows, 128) VMEM tiles.
        x = x_ref[...]
        if native_lowp and jnp.dtype(x_ref.dtype) != jnp.dtype(jnp.float32):
            # v6e/v7x have a bf16 VALU: multiply in the native dtype so packed
            # [16,128] vregs stay packed (no f32 unpack/repack, half the vregs).
            o_ref[...] = x * s_ref[0].astype(x_ref.dtype)
        else:
            # Exact f32 path (also used for low-precision inputs on v5e).
            o_ref[...] = (x * s_ref[0]).astype(o_ref.dtype)
    return kernel


def _scale_slab(x2d, scale_f32, cfg, donate_input):
    """Runs the kernel on a lane-dense (rows, 128) slab."""
    rows = x2d.shape[0]
    itemsize = jnp.dtype(x2d.dtype).itemsize
    n = rows * _LANE

    # Sublane multiple depends on dtype packing (f32: 8, bf16: 16, 8-bit: 32).
    sub_mult = 8 * max(1, 4 // itemsize)
    target_rows = max(sub_mult, cfg["block_bytes"] // (_LANE * itemsize))
    if rows <= target_rows:
        tile_rows = rows                           # single full-array block
    else:
        tile_rows = _round_up(target_rows, sub_mult)
    grid = (pl.cdiv(rows, tile_rows),)             # ragged edge block is masked

    # 2 double-buffered tiles each for input and output.
    resident = 2 * 2 * tile_rows * _LANE * itemsize
    vmem_limit = None
    if cfg["vmem_cap"] is not None:
        vmem_limit = min(cfg["vmem_cap"], max(32 * _MiB, resident + 16 * _MiB))

    dim_sem = (pltpu.CORE_PARALLEL,) if cfg["core_parallel"] else ("parallel",)

    extra = {}
    if donate_input:
        # Caller must donate x at the jit boundary; lets the op run in place.
        extra["input_output_aliases"] = {1: 0}

    return pl.pallas_call(
        _make_scale_kernel(cfg["native_lowp"]),
        out_shape=jax.ShapeDtypeStruct((rows, _LANE), x2d.dtype),
        grid_spec=pltpu.PrefetchScalarGridSpec(
            num_scalar_prefetch=0,
            grid=grid,
            in_specs=[
                pl.BlockSpec(memory_space=pltpu.SMEM),              # scale (1,)
                pl.BlockSpec((tile_rows, _LANE), lambda i: (i, 0)),  # x tile
            ],
            out_specs=pl.BlockSpec((tile_rows, _LANE), lambda i: (i, 0)),
        ),
        compiler_params=pltpu.CompilerParams(
            dimension_semantics=dim_sem,
            vmem_limit_bytes=vmem_limit),
        cost_estimate=pl.CostEstimate(
            flops=n,
            transcendentals=0,
            bytes_accessed=2 * n * itemsize + 4),
        **extra,
    )(scale_f32, x2d)


def _tail_mul(v, scale_f32, cfg):
    """Plain-jnp multiply for the sub-128-element tail / tiny inputs."""
    if cfg["native_lowp"] and v.dtype != jnp.float32:
        return v * scale_f32[0].astype(v.dtype)
    return (v.astype(jnp.float32) * scale_f32[0]).astype(v.dtype)


def scale_forward(x, scale, *, donate_input=False):
    """Computes x * scale (1-element parameter), matching torch Scale.forward
    for floating-point activations.

    TODO(synk): for bf16/f16 inputs, torch promotes (x * f32-Parameter) to an
    f32 output; this kernel intentionally keeps x.dtype (activation-preserving).
    Integer inputs would need torch type-promotion rules as well.
    """
    cfg = _hw_config()
    orig_shape = x.shape
    n = x.size
    scale_f32 = jnp.asarray(scale, dtype=jnp.float32).reshape((1,))

    flat = x.reshape(-1)
    aligned_n = (n // _LANE) * _LANE

    if aligned_n == 0:
        # Tiny (<128 element) input: a Pallas launch is pure overhead.
        return _tail_mul(flat, scale_f32, cfg).reshape(orig_shape)

    if aligned_n == n:
        # Fast path: zero-copy lane-dense (rows, 128) slab.
        x2d = flat.reshape(n // _LANE, _LANE)
        return _scale_slab(x2d, scale_f32, cfg, donate_input).reshape(orig_shape)

    # Unaligned path: kernel on the 128-aligned prefix + jnp for the <128-elem
    # tail, instead of a whole-array pad before the kernel and a whole-array
    # slice after it (each of those was a full extra HBM pass).
    head = flat[:aligned_n].reshape(aligned_n // _LANE, _LANE)
    head_out = _scale_slab(head, scale_f32, cfg, donate_input).reshape(-1)
    tail_out = _tail_mul(flat[aligned_n:], scale_f32, cfg)
    return jnp.concatenate([head_out, tail_out]).reshape(orig_shape)


if __name__ == "__main__":
    key = jax.random.PRNGKey(0)
    k_aligned, k_unaligned = jax.random.split(key)

    # Parameter init matches torch: Parameter(FloatTensor([init_value]))
    init_value = 0.001
    scale_param = jnp.array([init_value], dtype=jnp.float32)

    fwd = jax.jit(scale_forward)

    # NCHW activation shape consistent with the module's usage (128-aligned).
    x = jax.random.normal(k_aligned, (2, 4, 16, 16), dtype=jnp.float32)
    out = jax.block_until_ready(fwd(x, scale_param))
    ref = x * scale_param[0]
    assert out.shape == x.shape and out.dtype == x.dtype
    assert jnp.allclose(out, ref, rtol=1e-6, atol=1e-6)

    # Also exercise the unaligned (aligned-prefix + tail) path: 3*5*7*11 = 1155.
    x2 = jax.random.normal(k_unaligned, (3, 5, 7, 11), dtype=jnp.float32)
    out2 = jax.block_until_ready(fwd(x2, scale_param))
    ref2 = x2 * scale_param[0]
    assert out2.shape == x2.shape and out2.dtype == x2.dtype
    assert jnp.allclose(out2, ref2, rtol=1e-6, atol=1e-6)

    print("KERNEL_OK")
</pallas_src>

<mosaic_0001>
module attributes {stable_mosaic.version = 11 : i64} {
  func.func @kernel(%arg0: i32, %arg1: memref<1xf32, #tpu.memory_space<smem>>, %arg2: memref<16x128xf32, #tpu.memory_space<vmem>>, %arg3: memref<16x128xf32, #tpu.memory_space<vmem>>) attributes {dimension_semantics = [#tpu.dimension_semantics<parallel>], iteration_bounds = array<i64: 1>, scalar_prefetch = 0 : i64, scratch_operands = 0 : i64, tpu.core_type = #tpu.core_type<tc>, window_params = [{transform_indices = @transform_0, window_bounds = array<i64: 1>}, {transform_indices = @transform_1, window_bounds = array<i64: 16, 128>}, {transform_indices = @transform_2, window_bounds = array<i64: 16, 128>}]} {
    %c0 = arith.constant 0 : index
    %c0_0 = arith.constant 0 : index
    %0 = vector.load %arg2[%c0, %c0_0] : memref<16x128xf32, #tpu.memory_space<vmem>>, vector<16x128xf32>
    %c0_1 = arith.constant 0 : index
    %1 = memref.load %arg1[%c0_1] : memref<1xf32, #tpu.memory_space<smem>>
    %2 = vector.broadcast %1 : f32 to vector<16x128xf32>
    %3 = arith.mulf %0, %2 : vector<16x128xf32>
    %c0_2 = arith.constant 0 : index
    %c0_3 = arith.constant 0 : index
    %4 = vector.load %arg3[%c0_2, %c0_3] : memref<16x128xf32, #tpu.memory_space<vmem>>, vector<16x128xf32>
    tpu.vector_store %arg3[%c0_2, %c0_3], %3 {strides = array<i32>} : memref<16x128xf32, #tpu.memory_space<vmem>>, vector<16x128xf32>,
    return
  }
  func.func @transform_0(%arg0: i32) -> i32 {
    %c0_i32 = arith.constant 0 : i32
    %c0_i32_0 = arith.constant 0 : i32
    return %c0_i32 : i32
  }
  func.func @transform_1(%arg0: i32) -> (i32, i32) {
    %c0_i32 = arith.constant 0 : i32
    %c0_i32_0 = arith.constant 0 : i32
    return %arg0, %c0_i32 : i32, i32
  }
  func.func @transform_2(%arg0: i32) -> (i32, i32) {
    %c0_i32 = arith.constant 0 : i32
    %c0_i32_0 = arith.constant 0 : i32
    return %arg0, %c0_i32 : i32, i32
  }
}

</mosaic_0001>

<bundles_post_ra>
// kernel: scale_forward.1
= control target key start
LH: loop header
LB: loop body
LE: loop exit
PB: predicated region body
PF: predicated region fallthrough
CT: control target
= control target key end

     0   :  { %s54_s0 = inlined_call_operand.<no memory space> [shape: f32[1], index: 0, kind: input, shape index: {}]   ;;  %s55_s1 = inlined_call_operand.vmem [shape: f32[16,128], index: 1, kind: input, shape index: {}]   ;;  %s56_s2 = inlined_call_operand.vmem [shape: f32[16,128], index: 2, kind: output, shape index: {}]  }
   0x1   :  { %v12_v0 = vld [vmem:[%s55_s1] sm:$0xff]  ;;  %v15_v1 = vstv %s54_s0  ;;  %v13_v2 = vld [vmem:[%s55_s1 + $0x8] sm:$0xff] }
   0x2   :  { %v16_v3 = vmul.f32 %v15_v1, %v12_v0  ;;  %v17_v4 = vmul.f32 %v15_v1, %v13_v2 }
   0x4   :  { %18 = vst [vmem:[%s56_s2] sm:$0xff] %v16_v3 }
   0x5   :  { %19 = vst [vmem:[%s56_s2 + $0x8] sm:$0xff] %v17_v4 }

</bundles_post_ra>
